<compile_context>
chip_gen: v5e
topology: v5e:2x2
jax: 0.10.0
libtpu: 0.0.40
codegen_flags: <defaults>
</compile_context>

<pallas_src>
import functools

import jax
import jax.numpy as jnp
from jax.experimental import pallas as pl
from jax.experimental.pallas import tpu as pltpu

LANE = 128
_VMEM = pl.BlockSpec(memory_space=pltpu.MemorySpace.VMEM)


# ---------------------------------------------------------------------------
# Fused Pallas kernel: layer1 + ReLU + layer2 + out-linear + ReLU + softmax
# ---------------------------------------------------------------------------
def _fused_kernel(a0_ref, a1_ref, x_ref, w1s_ref, w1n_ref, b1_ref,
                  w2s_ref, w2n_ref, b2_ref, wo_ref, bo_ref, o_ref,
                  *, n_dst0, n_dst1):
    bf16 = jnp.bfloat16
    f32 = jnp.float32

    # ---- layer 1: mean aggregation + split-weight linear + ReLU -------------
    x = x_ref[...]                                               # bf16 [n_src0, 128]
    h_neigh0 = jnp.dot(a0_ref[...], x, preferred_element_type=f32)
    z1 = (jnp.dot(x[:n_dst0], w1s_ref[...], preferred_element_type=f32)
          + jnp.dot(h_neigh0.astype(bf16), w1n_ref[...], preferred_element_type=f32)
          + b1_ref[...])
    h1 = jnp.maximum(z1, 0.0).astype(bf16)                       # [n_dst0, 128]

    # ---- layer 2 (no activation inside GCNLayer) -----------------------------
    h_neigh1 = jnp.dot(a1_ref[...], h1, preferred_element_type=f32)
    h2 = (jnp.dot(h1[:n_dst1], w2s_ref[...], preferred_element_type=f32)
          + jnp.dot(h_neigh1.astype(bf16), w2n_ref[...], preferred_element_type=f32)
          + b2_ref[...])                                         # f32 [n_dst1, 128]

    # ---- head: Linear -> ReLU -> softmax over the 2 real classes -------------
    zo = jnp.dot(h2.astype(bf16), wo_ref[...], preferred_element_type=f32) + bo_ref[...]
    zo = jnp.maximum(zo, 0.0)
    z0 = zo[:, 0:1]
    z1c = zo[:, 1:2]
    # softmax([z0, z1]) == [1 - p1, p1] with p1 = sigmoid(z1 - z0): one EUP exp
    # + one EUP approx reciprocal, no cross-lane max/sum, and zero-padded lanes
    # cannot leak probability mass.
    p1 = pl.reciprocal(1.0 + jnp.exp(z0 - z1c), approx=True)
    p0 = 1.0 - p1
    lane = jax.lax.broadcasted_iota(jnp.int32, o_ref.shape, 1)
    o_ref[...] = jnp.where(lane == 0, p0,
                           jnp.where(lane == 1, p1, 0.0)).astype(o_ref.dtype)


# ---------------------------------------------------------------------------
# Model wrapper (padding / casting glue in plain JAX)
# ---------------------------------------------------------------------------
def _pad_to(a, shape):
    return jnp.pad(a, [(0, t - s) for s, t in zip(a.shape, shape)])


def sage_convq_forward(params, adjs, x):
    """adjs: list of two row-normalized dense adjacency matrices [n_dst, n_src]."""
    a0, a1 = adjs
    n_dst0, n_src0 = a0.shape
    n_dst1 = a1.shape[0]
    bf16, f32 = jnp.bfloat16, jnp.float32

    # bf16 MXU inputs (f32 accumulation inside the kernel); feature dims padded
    # to 128 lanes so every matmul / store is lane-dense.  Zero-padding is exact
    # (padded weight rows/cols and bias lanes are zero).
    x_p = _pad_to(x, (n_src0, LANE)).astype(bf16)
    w1s = _pad_to(params["w1_self"], (LANE, LANE)).astype(bf16)
    w1n = _pad_to(params["w1_neigh"], (LANE, LANE)).astype(bf16)
    b1 = _pad_to(params["b1"], (1, LANE)).astype(f32)
    w2s = _pad_to(params["w2_self"], (LANE, LANE)).astype(bf16)
    w2n = _pad_to(params["w2_neigh"], (LANE, LANE)).astype(bf16)
    b2 = _pad_to(params["b2"], (1, LANE)).astype(f32)
    wo = _pad_to(params["w_out"], (LANE, LANE)).astype(bf16)
    bo = _pad_to(params["b_out"], (1, LANE)).astype(f32)

    out_pad = pl.pallas_call(
        functools.partial(_fused_kernel, n_dst0=n_dst0, n_dst1=n_dst1),
        out_shape=jax.ShapeDtypeStruct((n_dst1, LANE), f32),
        in_specs=[_VMEM] * 11,
        out_specs=_VMEM,
    )(a0.astype(bf16), a1.astype(bf16), x_p,
      w1s, w1n, b1, w2s, w2n, b2, wo, bo)

    # Lane-dense [n_dst1, 128] slab out of the kernel; real probabilities are
    # lanes 0:2 — slice in the JAX wrapper.
    return out_pad[:, :2]


def make_params(key, in_feats, h_feats, num_classes):
    ks = jax.random.split(key, 6)

    def linear_init(kw, kb, fan_in, fan_out):
        bound = 1.0 / jnp.sqrt(fan_in)
        w = jax.random.uniform(kw, (fan_in, fan_out), jnp.float32, -bound, bound)
        b = jax.random.uniform(kb, (1, fan_out), jnp.float32, -bound, bound)
        return w, b

    # GCNLayer linears take cat([h_dst, h_neigh]) -> split weight into two halves.
    w1, b1 = linear_init(ks[0], ks[1], 2 * in_feats, h_feats)
    w2, b2 = linear_init(ks[2], ks[3], 2 * h_feats, num_classes)
    wo, bo = linear_init(ks[4], ks[5], num_classes, 2)
    return {
        "w1_self": w1[:in_feats], "w1_neigh": w1[in_feats:], "b1": b1,
        "w2_self": w2[:h_feats], "w2_neigh": w2[h_feats:], "b2": b2,
        "w_out": wo, "b_out": bo,
    }


def make_block_adj(key, n_dst, n_src):
    """Random bipartite block, row-normalized (mean aggregation), in-degree >= 1."""
    a = (jax.random.uniform(key, (n_dst, n_src)) < 0.4).astype(jnp.float32)
    # guarantee at least one neighbor per dst node (self edge onto same index)
    a = jnp.maximum(a, jnp.eye(n_dst, n_src, dtype=jnp.float32))
    deg = jnp.sum(a, axis=1, keepdims=True)
    return a / jnp.maximum(deg, 1.0)


if __name__ == "__main__":
    in_feats, h_feats, num_classes = 16, 32, 8
    n_src0, n_dst0, n_dst1 = 16, 8, 8   # MFG sizes: layer2 src nodes == layer1 dst nodes

    key = jax.random.PRNGKey(0)
    k_x, k_a0, k_a1, k_p = jax.random.split(key, 4)

    x = jax.random.normal(k_x, (n_src0, in_feats), jnp.float32)
    adjs = [make_block_adj(k_a0, n_dst0, n_src0),
            make_block_adj(k_a1, n_dst1, n_dst0)]
    params = make_params(k_p, in_feats, h_feats, num_classes)

    out = sage_convq_forward(params, adjs, x)
    jax.block_until_ready(out)

    assert out.shape == (n_dst1, 2)
    assert bool(jnp.all(out >= 0.0))
    assert bool(jnp.allclose(jnp.sum(out, axis=1), 1.0, atol=1e-5))
    print("KERNEL_OK")
</pallas_src>

<mosaic_0001>
module attributes {stable_mosaic.version = 11 : i64} {
  func.func @_fused_kernel(%arg0: memref<8x16xbf16, #tpu.memory_space<vmem>>, %arg1: memref<8x8xbf16, #tpu.memory_space<vmem>>, %arg2: memref<16x128xbf16, #tpu.memory_space<vmem>>, %arg3: memref<128x128xbf16, #tpu.memory_space<vmem>>, %arg4: memref<128x128xbf16, #tpu.memory_space<vmem>>, %arg5: memref<1x128xf32, #tpu.memory_space<vmem>>, %arg6: memref<128x128xbf16, #tpu.memory_space<vmem>>, %arg7: memref<128x128xbf16, #tpu.memory_space<vmem>>, %arg8: memref<1x128xf32, #tpu.memory_space<vmem>>, %arg9: memref<128x128xbf16, #tpu.memory_space<vmem>>, %arg10: memref<1x128xf32, #tpu.memory_space<vmem>>, %arg11: memref<8x128xf32, #tpu.memory_space<vmem>>) attributes {dimension_semantics = [], scalar_prefetch = 0 : i64, scratch_operands = 0 : i64, tpu.core_type = #tpu.core_type<tc>} {
    %c0 = arith.constant 0 : index
    %c0_0 = arith.constant 0 : index
    %0 = vector.load %arg2[%c0, %c0_0] : memref<16x128xbf16, #tpu.memory_space<vmem>>, vector<16x128xbf16>
    %c0_1 = arith.constant 0 : index
    %c0_2 = arith.constant 0 : index
    %1 = vector.load %arg0[%c0_1, %c0_2] : memref<8x16xbf16, #tpu.memory_space<vmem>>, vector<8x16xbf16>
    %cst = arith.constant dense<0.000000e+00> : vector<8x128xf32>
    %2 = tpu.matmul %1, %0, %cst {dimension_numbers = #tpu.dot_dimension_numbers<[1], [0], [0], [1], [0, 0, 1, 1], [], []>} : vector<8x16xbf16>, vector<16x128xbf16>, vector<8x128xf32> -> vector<8x128xf32>
    %3 = vector.extract_strided_slice %0 {offsets = [0, 0], sizes = [8, 128], strides = [1, 1]} : vector<16x128xbf16> to vector<8x128xbf16>
    %c0_3 = arith.constant 0 : index
    %c0_4 = arith.constant 0 : index
    %4 = vector.load %arg3[%c0_3, %c0_4] : memref<128x128xbf16, #tpu.memory_space<vmem>>, vector<128x128xbf16>
    %cst_5 = arith.constant dense<0.000000e+00> : vector<8x128xf32>
    %5 = tpu.matmul %3, %4, %cst_5 {dimension_numbers = #tpu.dot_dimension_numbers<[1], [0], [0], [1], [0, 0, 1, 1], [], []>} : vector<8x128xbf16>, vector<128x128xbf16>, vector<8x128xf32> -> vector<8x128xf32>
    %6 = arith.truncf %2 : vector<8x128xf32> to vector<8x128xbf16>
    %c0_6 = arith.constant 0 : index
    %c0_7 = arith.constant 0 : index
    %7 = vector.load %arg4[%c0_6, %c0_7] : memref<128x128xbf16, #tpu.memory_space<vmem>>, vector<128x128xbf16>
    %cst_8 = arith.constant dense<0.000000e+00> : vector<8x128xf32>
    %8 = tpu.matmul %6, %7, %cst_8 {dimension_numbers = #tpu.dot_dimension_numbers<[1], [0], [0], [1], [0, 0, 1, 1], [], []>} : vector<8x128xbf16>, vector<128x128xbf16>, vector<8x128xf32> -> vector<8x128xf32>
    %9 = arith.addf %5, %8 : vector<8x128xf32>
    %c0_9 = arith.constant 0 : index
    %c0_10 = arith.constant 0 : index
    %10 = vector.load %arg5[%c0_9, %c0_10] : memref<1x128xf32, #tpu.memory_space<vmem>>, vector<1x128xf32>
    %11 = vector.broadcast %10 : vector<1x128xf32> to vector<8x128xf32>
    %12 = arith.addf %9, %11 : vector<8x128xf32>
    %cst_11 = arith.constant 0.000000e+00 : f32
    %13 = vector.broadcast %cst_11 : f32 to vector<8x128xf32>
    %14 = arith.maximumf %12, %13 : vector<8x128xf32>
    %15 = arith.truncf %14 : vector<8x128xf32> to vector<8x128xbf16>
    %c0_12 = arith.constant 0 : index
    %c0_13 = arith.constant 0 : index
    %16 = vector.load %arg1[%c0_12, %c0_13] : memref<8x8xbf16, #tpu.memory_space<vmem>>, vector<8x8xbf16>
    %cst_14 = arith.constant dense<0.000000e+00> : vector<8x128xf32>
    %17 = tpu.matmul %16, %15, %cst_14 {dimension_numbers = #tpu.dot_dimension_numbers<[1], [0], [0], [1], [0, 0, 1, 1], [], []>} : vector<8x8xbf16>, vector<8x128xbf16>, vector<8x128xf32> -> vector<8x128xf32>
    %c0_15 = arith.constant 0 : index
    %c0_16 = arith.constant 0 : index
    %18 = vector.load %arg6[%c0_15, %c0_16] : memref<128x128xbf16, #tpu.memory_space<vmem>>, vector<128x128xbf16>
    %cst_17 = arith.constant dense<0.000000e+00> : vector<8x128xf32>
    %19 = tpu.matmul %15, %18, %cst_17 {dimension_numbers = #tpu.dot_dimension_numbers<[1], [0], [0], [1], [0, 0, 1, 1], [], []>} : vector<8x128xbf16>, vector<128x128xbf16>, vector<8x128xf32> -> vector<8x128xf32>
    %20 = arith.truncf %17 : vector<8x128xf32> to vector<8x128xbf16>
    %c0_18 = arith.constant 0 : index
    %c0_19 = arith.constant 0 : index
    %21 = vector.load %arg7[%c0_18, %c0_19] : memref<128x128xbf16, #tpu.memory_space<vmem>>, vector<128x128xbf16>
    %cst_20 = arith.constant dense<0.000000e+00> : vector<8x128xf32>
    %22 = tpu.matmul %20, %21, %cst_20 {dimension_numbers = #tpu.dot_dimension_numbers<[1], [0], [0], [1], [0, 0, 1, 1], [], []>} : vector<8x128xbf16>, vector<128x128xbf16>, vector<8x128xf32> -> vector<8x128xf32>
    %23 = arith.addf %19, %22 : vector<8x128xf32>
    %c0_21 = arith.constant 0 : index
    %c0_22 = arith.constant 0 : index
    %24 = vector.load %arg8[%c0_21, %c0_22] : memref<1x128xf32, #tpu.memory_space<vmem>>, vector<1x128xf32>
    %25 = vector.broadcast %24 : vector<1x128xf32> to vector<8x128xf32>
    %26 = arith.addf %23, %25 : vector<8x128xf32>
    %27 = arith.truncf %26 : vector<8x128xf32> to vector<8x128xbf16>
    %c0_23 = arith.constant 0 : index
    %c0_24 = arith.constant 0 : index
    %28 = vector.load %arg9[%c0_23, %c0_24] : memref<128x128xbf16, #tpu.memory_space<vmem>>, vector<128x128xbf16>
    %cst_25 = arith.constant dense<0.000000e+00> : vector<8x128xf32>
    %29 = tpu.matmul %27, %28, %cst_25 {dimension_numbers = #tpu.dot_dimension_numbers<[1], [0], [0], [1], [0, 0, 1, 1], [], []>} : vector<8x128xbf16>, vector<128x128xbf16>, vector<8x128xf32> -> vector<8x128xf32>
    %c0_26 = arith.constant 0 : index
    %c0_27 = arith.constant 0 : index
    %30 = vector.load %arg10[%c0_26, %c0_27] : memref<1x128xf32, #tpu.memory_space<vmem>>, vector<1x128xf32>
    %31 = vector.broadcast %30 : vector<1x128xf32> to vector<8x128xf32>
    %32 = arith.addf %29, %31 : vector<8x128xf32>
    %cst_28 = arith.constant 0.000000e+00 : f32
    %33 = vector.broadcast %cst_28 : f32 to vector<8x128xf32>
    %34 = arith.maximumf %32, %33 : vector<8x128xf32>
    %35 = vector.extract_strided_slice %34 {offsets = [0, 0], sizes = [8, 1], strides = [1, 1]} : vector<8x128xf32> to vector<8x1xf32>
    %36 = vector.extract_strided_slice %34 {offsets = [0, 1], sizes = [8, 1], strides = [1, 1]} : vector<8x128xf32> to vector<8x1xf32>
    %37 = arith.subf %35, %36 : vector<8x1xf32>
    %38 = math.exp %37 : vector<8x1xf32>
    %cst_29 = arith.constant 1.000000e+00 : f32
    %39 = vector.broadcast %cst_29 : f32 to vector<8x1xf32>
    %40 = arith.addf %39, %38 : vector<8x1xf32>
    %41 = tpu.reciprocal %40 {approx = true} : vector<8x1xf32> -> vector<8x1xf32>
    %cst_30 = arith.constant 1.000000e+00 : f32
    %42 = vector.broadcast %cst_30 : f32 to vector<8x1xf32>
    %43 = arith.subf %42, %41 : vector<8x1xf32>
    %44 = tpu.iota {dimensions = array<i32: 1>} : vector<8x128xi32>
    %c0_i32 = arith.constant 0 : i32
    %45 = vector.broadcast %c0_i32 : i32 to vector<8x128xi32>
    %46 = arith.cmpi eq, %44, %45 : vector<8x128xi32>
    %c1_i32 = arith.constant 1 : i32
    %47 = vector.broadcast %c1_i32 : i32 to vector<8x128xi32>
    %48 = arith.cmpi eq, %44, %47 : vector<8x128xi32>
    %cst_31 = arith.constant 0.000000e+00 : f32
    %49 = vector.shape_cast %41 : vector<8x1xf32> to vector<8x1xf32>
    %50 = vector.broadcast %49 : vector<8x1xf32> to vector<8x128xf32>
    %51 = vector.broadcast %cst_31 : f32 to vector<8x128xf32>
    %52 = arith.select %48, %50, %51 : vector<8x128xi1>, vector<8x128xf32>
    %53 = vector.shape_cast %43 : vector<8x1xf32> to vector<8x1xf32>
    %54 = vector.broadcast %53 : vector<8x1xf32> to vector<8x128xf32>
    %55 = arith.select %46, %54, %52 : vector<8x128xi1>, vector<8x128xf32>
    %c0_32 = arith.constant 0 : index
    %c0_33 = arith.constant 0 : index
    %56 = vector.load %arg11[%c0_32, %c0_33] : memref<8x128xf32, #tpu.memory_space<vmem>>, vector<8x128xf32>
    tpu.vector_store %arg11[%c0_32, %c0_33], %55 {strides = array<i32>} : memref<8x128xf32, #tpu.memory_space<vmem>>, vector<8x128xf32>,
    return
  }
}

</mosaic_0001>

<bundles_post_ra>
// kernel: tpu_custom_call.1
= control target key start
LH: loop header
LB: loop body
LE: loop exit
PB: predicated region body
PF: predicated region fallthrough
CT: control target
= control target key end

     0   :  { %16 = vsyncpa [#allocation3], 0  ;;  %s1246_s0 = inlined_call_operand.hbm [shape: bf16[8,16], index: 0, kind: input, shape index: {}]   ;;  %s1247_s1 = inlined_call_operand.hbm [shape: bf16[8,8], index: 1, kind: input, shape index: {}]   ;;  %s1248_s2 = inlined_call_operand.hbm [shape: bf16[16,128], index: 2, kind: input, shape index: {}]   ;;  %s1249_s3 = inlined_call_operand.hbm [shape: bf16[128,128], index: 3, kind: input, shape index: {}]   ;;  %s1250_s4 = inlined_call_operand.hbm [shape: bf16[128,128], index: 4, kind: input, shape index: {}]   ;;  %s1251_s5 = inlined_call_operand.vmem [shape: f32[1,128], index: 5, kind: input, shape index: {}]   ;;  %s1252_s6 = inlined_call_operand.hbm [shape: bf16[128,128], index: 6, kind: input, shape index: {}]   ;;  %s1253_s7 = inlined_call_operand.hbm [shape: bf16[128,128], index: 7, kind: input, shape index: {}]   ;;  %s1254_s8 = inlined_call_operand.vmem [shape: f32[1,128], index: 8, kind: input, shape index: {}]   ;;  %s1255_s9 = inlined_call_operand.hbm [shape: bf16[128,128], index: 9, kind: input, shape index: {}]   ;;  %s1256_s10 = inlined_call_operand.vmem [shape: f32[1,128], index: 10, kind: input, shape index: {}]   ;;  %s1257_s11 = inlined_call_operand.hbm [shape: f32[8,128], index: 11, kind: output, shape index: {}]  }
   0x1   :  { %17 = vsyncpa [#allocation6], 0 }
   0x2   :  { %18 = vsyncpa [#allocation9], 0 }
   0x3   :  { %19 = vsyncpa [#allocation12], 0 }
   0x4   :  { %20 = vsyncpa [#allocation15], 0  ;;  %s38_s19 = sshll.u32 %s1247_s1, 4  ;;  %s39_s19 = int_to_ptr.hbm [resolvable:$true] %s38_s19 }
   0x5   :  { %21 = vsyncpa [#allocation4], 0  ;;  %s1119_s20 = smov [#allocation5]   ;;  %s61_s24 = sshll.u32 %s1249_s3, 4  ;;  %s62_s24 = int_to_ptr.hbm [resolvable:$true] %s61_s24 }
   0x6   :  { %s40_s21 = sshll.u32 %s1119_s20, 4  ;;  %s1120_s25 = smov [#allocation8]   ;;  %s41_s21 = int_to_ptr.vmem [resolvable:$true] %s40_s21 }
   0x7   :  { %43 = dma.hbm_to_vmem [thread:$0]  %s39_s19, 64, %s41_s21, [#allocation6]  }
   0x8   :  { %s63_s26 = sshll.u32 %s1120_s25, 4  ;;  %s89_s29 = sshll.u32 %s1252_s6, 4  ;;  %s64_s26 = int_to_ptr.vmem [resolvable:$true] %s63_s26  ;;  %s90_s29 = int_to_ptr.hbm [resolvable:$true] %s89_s29 }
   0x9   :  { %s1121_s1 = smov 64   ;;  %s1122_s30 = smov 4  }
   0xa   :  { %69 = dma.hbm_to_vmem [thread:$0]  %s62_s24, 1024, %s64_s26, [#allocation9], %s1121_s1, %s1121_s1, %s1122_s30  }
   0xb   :  { %s27_s14 = sshll.u32 %s1246_s0, 4  ;;  %s1123_s3 = smov [#allocation11]   ;;  %s28_s14 = int_to_ptr.hbm [resolvable:$true] %s27_s14 }
   0xc   :  { %s91_s15 = sshll.u32 %s1123_s3, 4  ;;  %s1124_s6 = smov [#allocation2]   ;;  %s92_s15 = int_to_ptr.vmem [resolvable:$true] %s91_s15 }
   0xd   :  { %97 = dma.hbm_to_vmem [thread:$0]  %s90_s29, 1024, %s92_s15, [#allocation12], %s1121_s1, %s1121_s1, %s1122_s30  }
   0xe   :  { %s29_s16 = sshll.u32 %s1124_s6, 4  ;;  %s48_s19 = sshll.u32 %s1248_s2, 4  ;;  %s30_s16 = int_to_ptr.vmem [resolvable:$true] %s29_s16  ;;  %s49_s19 = int_to_ptr.hbm [resolvable:$true] %s48_s19 }
   0xf   :  { %32 = dma.hbm_to_vmem [thread:$0]  %s28_s14, 64, %s30_s16, [#allocation3]  }
  0x10   :  { %s74_s0 = sshll.u32 %s1250_s4, 4  ;;  %s1125_s22 = smov [#allocation7]   ;;  %s75_s0 = int_to_ptr.hbm [resolvable:$true] %s74_s0 }
  0x11   :  { %s50_s23 = sshll.u32 %s1125_s22, 4  ;;  %s1126_s24 = smov [#allocation10]   ;;  %s51_s23 = int_to_ptr.vmem [resolvable:$true] %s50_s23 }
  0x12   :  { %56 = dma.hbm_to_vmem [thread:$0]  %s49_s19, 128, %s51_s23, [#allocation6], %s1121_s1, %s1121_s1, %s1122_s30  }
  0x13   :  { %s76_s25 = sshll.u32 %s1126_s24, 4  ;;  %s102_s2 = sshll.u32 %s1253_s7, 4  ;;  %s77_s25 = int_to_ptr.vmem [resolvable:$true] %s76_s25  ;;  %s103_s2 = int_to_ptr.hbm [resolvable:$true] %s102_s2 }
  0x14   :  { %82 = dma.hbm_to_vmem [thread:$0]  %s75_s0, 1024, %s77_s25, [#allocation9], %s1121_s1, %s1121_s1, %s1122_s30  }
  0x15   :  { %s117_s29 = sshll.u32 %s1255_s9, 4  ;;  %s1127_s12 = smov [#allocation13]   ;;  %s118_s29 = int_to_ptr.hbm [resolvable:$true] %s117_s29 }
  0x16   :  { %s104_s13 = sshll.u32 %s1127_s12, 4  ;;  %s1128_s14 = smov [#allocation14]   ;;  %s105_s13 = int_to_ptr.vmem [resolvable:$true] %s104_s13 }
  0x17   :  { %110 = dma.hbm_to_vmem [thread:$0]  %s103_s2, 1024, %s105_s13, [#allocation12], %s1121_s1, %s1121_s1, %s1122_s30  }
  0x18   :  { %s119_s7 = sshll.u32 %s1128_s14, 4  ;;  %s120_s7 = int_to_ptr.vmem [resolvable:$true] %s119_s7 }
  0x19   :  { %125 = dma.hbm_to_vmem [thread:$0]  %s118_s29, 1024, %s120_s7, [#allocation15], %s1121_s1, %s1121_s1, %s1122_s30  }
  0x1a   :  { %1107 = dma.done.wait [#allocation3], 64  }
  0x1b   :  { %1108 = vsyncadd [#allocation3], 4294967232 }
  0x1c   :  { %1109 = dma.done.wait [#allocation6], 192  }
  0x1d   :  { %1110 = vsyncadd [#allocation6], 4294967104 }
  0x1e   :  { %1111 = dma.done.wait [#allocation9], 2048  }
  0x1f   :  { %1112 = vsyncadd [#allocation9], 4294965248 }
  0x20   :  { %1113 = dma.done.wait [#allocation12], 2048  }
  0x21   :  { %1114 = vsyncadd [#allocation12], 4294965248 }
  0x22   :  { %1115 = dma.done.wait [#allocation15], 1024  }
  0x23   :  { %1116 = vsyncadd [#allocation15], 4294966272  ;;  %v828_v0 = vld [vmem:[#allocation7] sm:$0xff]  ;;  %v163_v2 = vld [vmem:[#allocation2] sm:$0xf]  ;;  %vm170_vm0 = vcmask 130048  }
  0x24   :  { %v836_v1 = vld [vmem:[#allocation8 + $0x38] sm:$0xff]  ;;  %181 = vmatpush.bf16.msra.mxu0 %v828_v0  ;;  %v835_v3 = vld [vmem:[#allocation8 + $0x30] sm:$0xff]  ;;  %v834_v6 = vld [vmem:[#allocation8 + $0x28] sm:$0xff]  ;;  %vm354_vm1 = vcmask 1043456   ;;  %vm350_vm2 = vcmask 64512   ;;  %s1129_s6 = smov 127  }
  0x25   :  { %329 = vmatpush.bf16.msra.mxu2 %v836_v1  ;;  %v844_v4 = vld [vmem:[#allocation10 + $0x38] sm:$0xff]  ;;  %v843_v5 = vld [vmem:[#allocation10 + $0x30] sm:$0xff]  ;;  %v842_v7 = vld [vmem:[#allocation10 + $0x28] sm:$0xff]  ;;  %s648_s18 = sshll.u32 %s1257_s11, 4  ;;  %s649_s18 = int_to_ptr.hbm [resolvable:$true] %s648_s18 }
  0x26   :  { %268 = vmatpush.bf16.msra.mxu1 %v844_v4  ;;  %v833_v8 = vld [vmem:[#allocation8 + $0x20] sm:$0xff]  ;;  %v832_v10 = vld [vmem:[#allocation8 + $0x18] sm:$0xff]  ;;  %v831_v12 = vld [vmem:[#allocation8 + $0x10] sm:$0xff] }
  0x27   :  { %666 = vmatmul.msk.bf16.vlgmr.msra.gmra.mxu0 %vm170_vm0, %v163_v2  ;;  %v841_v9 = vld [vmem:[#allocation10 + $0x20] sm:$0xff]  ;;  %v840_v11 = vld [vmem:[#allocation10 + $0x18] sm:$0xff]  ;;  %v839_v13 = vld [vmem:[#allocation10 + $0x10] sm:$0xff] }
  0x28   :  { %v830_v14 = vld [vmem:[#allocation8 + $0x8] sm:$0xff]  ;;  %v829_v16 = vld [vmem:[#allocation8] sm:$0xff]  ;;  %v161_v17 = vld [vmem:[#allocation7] sm:$0xf] }
  0x29   :  { %330 = vmatpush.bf16.msra.mxu2 %v835_v3  ;;  %v838_v15 = vld [vmem:[#allocation10 + $0x8] sm:$0xff]  ;;  %v837_v18 = vld [vmem:[#allocation10] sm:$0xff]  ;;  %v884_v24 = vld [vmem:[%s1251_s5] ss:$0 sm:$0xff] }
  0x2a   :  { %269 = vmatpush.bf16.msra.mxu1 %v843_v5  ;;  %v852_v30 = vld [vmem:[#allocation11 + $0x38] sm:$0xff]  ;;  %v349_v33 = vld [vmem:[#allocation5] sm:$0xf]  ;;  %v850_v37 = vld [vmem:[#allocation11 + $0x28] sm:$0xff] }
  0x2b   :  { %v860_v34 = vld [vmem:[#allocation13 + $0x38] sm:$0xff]  ;;  %v851_v35 = vld [vmem:[#allocation11 + $0x30] sm:$0xff]  ;;  %v858_v38 = vld [vmem:[#allocation13 + $0x28] sm:$0xff] }
  0x2c   :  { %452 = vmatpush.bf16.msrb.mxu0 %v860_v34  ;;  %v859_v36 = vld [vmem:[#allocation13 + $0x30] sm:$0xff]  ;;  %v849_v39 = vld [vmem:[#allocation11 + $0x20] sm:$0xff]  ;;  %v848_v41 = vld [vmem:[#allocation11 + $0x18] sm:$0xff] }
  0x2d   :  { %331 = vmatpush.bf16.msra.mxu2 %v834_v6  ;;  %v857_v40 = vld [vmem:[#allocation13 + $0x20] sm:$0xff]  ;;  %v856_v42 = vld [vmem:[#allocation13 + $0x18] sm:$0xff]  ;;  %v847_v43 = vld [vmem:[#allocation11 + $0x10] sm:$0xff] }
  0x2e   :  { %270 = vmatpush.bf16.msra.mxu1 %v842_v7  ;;  %v855_v44 = vld [vmem:[#allocation13 + $0x10] sm:$0xff]  ;;  %v846_v45 = vld [vmem:[#allocation11 + $0x8] sm:$0xff]  ;;  %v845_v47 = vld [vmem:[#allocation11] sm:$0xff] }
  0x2f   :  { %v854_v46 = vld [vmem:[#allocation13 + $0x8] sm:$0xff]  ;;  %v853_v48 = vld [vmem:[#allocation13] sm:$0xff]  ;;  %v868_v51 = vld [vmem:[#allocation14 + $0x38] sm:$0xff] }
  0x30   :  { %453 = vmatpush.bf16.msrb.mxu0 %v859_v36  ;;  %v867_v52 = vld [vmem:[#allocation14 + $0x30] sm:$0xff]  ;;  %v866_v54 = vld [vmem:[#allocation14 + $0x28] sm:$0xff]  ;;  %v865_v55 = vld [vmem:[#allocation14 + $0x20] sm:$0xff] }
  0x31   :  { %332 = vmatpush.bf16.msra.mxu2 %v833_v8  ;;  %v864_v56 = vld [vmem:[#allocation14 + $0x18] sm:$0xff]  ;;  %v863_v57 = vld [vmem:[#allocation14 + $0x10] sm:$0xff]  ;;  %v862_v60 = vld [vmem:[#allocation14 + $0x8] sm:$0xff] }
  0x32   :  { %271 = vmatpush.bf16.msra.mxu1 %v841_v9  ;;  %v861_v61 = vld [vmem:[#allocation14] sm:$0xff]  ;;  %v885_v62 = vld [vmem:[%s1254_s8] ss:$0 sm:$0xff]  ;;  %v1130_v9 = vmov 0   ;;  %s1131_s8 = smov [#allocation16]  }
  0x33   :  { %v886_v4 = vld [vmem:[%s1256_s10] ss:$0 sm:$0xff]  ;;  %882 = vset.pattern.permute.xlu0 %v1130_v9  ;;  %883 = vset.pattern.permute.xlu1 %v1130_v9  ;;  %s646_s10 = sshll.u32 %s1131_s8, 4  ;;  %s647_s10 = int_to_ptr.vmem [resolvable:$true] %s646_s10 }
  0x34   :  { %454 = vmatpush.bf16.msrb.mxu0 %v858_v38 }
  0x35   :  { %333 = vmatpush.bf16.msra.mxu2 %v832_v10 }
  0x36   :  { %272 = vmatpush.bf16.msra.mxu1 %v840_v11 }
  0x38   :  { %455 = vmatpush.bf16.msrb.mxu0 %v857_v40 }
  0x39   :  { %334 = vmatpush.bf16.msra.mxu2 %v831_v12 }
  0x3a   :  { %273 = vmatpush.bf16.msra.mxu1 %v839_v13 }
  0x3c   :  { %456 = vmatpush.bf16.msrb.mxu0 %v856_v42 }
  0x3d   :  { %335 = vmatpush.bf16.msra.mxu2 %v830_v14 }
  0x3e   :  { %274 = vmatpush.bf16.msra.mxu1 %v838_v15 }
  0x40   :  { %457 = vmatpush.bf16.msrb.mxu0 %v855_v44 }
  0x41   :  { %336 = vmatpush.bf16.msra.mxu2 %v829_v16 }
  0x42   :  { %275 = vmatpush.bf16.msra.mxu1 %v837_v18 }
  0x44   :  { %337 = vmatmul.bf16.vlgmr.msra.gmra.mxu2 %v161_v17  ;;  %458 = vmatpush.bf16.msrb.mxu0 %v854_v46  ;;  %v624_v17 = vlaneseq }
  0x46   :  { %600 = vmatpush.bf16.msrb.mxu1 %v868_v51  ;;  %v625_v18 = vand.u32 127, %v624_v17 }
  0x48   :  { %459 = vmatpush.bf16.msrb.mxu0 %v853_v48  ;;  %vm627_vm3 = vcmp.eq.s32.totalorder %v625_v18, 1  ;;  %vm626_vm4 = vcmp.eq.s32.totalorder %v625_v18, 0 }
  0x4a   :  { %601 = vmatpush.bf16.msrb.mxu1 %v867_v52 }
  0x4e   :  { %602 = vmatpush.bf16.msrb.mxu1 %v866_v54 }
  0x52   :  { %603 = vmatpush.bf16.msrb.mxu1 %v865_v55 }
  0x56   :  { %604 = vmatpush.bf16.msrb.mxu1 %v864_v56 }
  0x5a   :  { %605 = vmatpush.bf16.msrb.mxu1 %v863_v57 }
  0x5e   :  { %606 = vmatpush.bf16.msrb.mxu1 %v862_v60 }
  0x62   :  { %607 = vmatpush.bf16.msrb.mxu1 %v861_v61 }
  0xa4   :  { %v183_v19 = vpop.f32.mrf.mxu0 }
  0xa5   :  { %v203_v20 = vpack.c.bf16 %v183_v19, %v183_v19 }
  0xa7   :  { %276 = vmatmul.bf16.vlgmr.msra.gmra.mxu1 %v203_v20 }
  0xac   :  { %v185_v21 = vpop.f32.mrf.mxu0 }
  0xc7   :  { %v338_v22 = vpop.f32.mrf.mxu2 }
  0xcf   :  { %v340_v23 = vpop.f32.mrf.mxu2 }
 0x124   :  { %v277_v25 = vpop.f32.mrf.mxu1 }
 0x125   :  { %v339_v26 = vadd.f32 %v338_v22, %v277_v25 }
 0x127   :  { %v346_v27 = vadd.f32 %v884_v24, %v339_v26 }
 0x129   :  { %v347_v28 = vmax.f32 %v346_v27, 0.0 }
 0x12b   :  { %v348_v29 = vpack.c.bf16 %v347_v28, %v347_v28 }
 0x12c   :  { %v279_v31 = vpop.f32.mrf.mxu1 }
 0x12d   :  { %v356_v32 = vsel %vm354_vm1, %v348_v29, 0 }
 0x12e   :  { %365 = vmatpush.bf16.msra.mxu3 %v356_v32 }
 0x131   :  { %731 = vmatmul.msk.bf16.vlgmr.msra.gmra.mxu3 %vm350_vm2, %v349_v33 }
 0x132   :  { %513 = vmatpush.bf16.msrb.mxu3 %v852_v30 }
 0x136   :  { %514 = vmatpush.bf16.msrb.mxu3 %v851_v35 }
 0x13a   :  { %515 = vmatpush.bf16.msrb.mxu3 %v850_v37 }
 0x13e   :  { %516 = vmatpush.bf16.msrb.mxu3 %v849_v39 }
 0x142   :  { %517 = vmatpush.bf16.msrb.mxu3 %v848_v41 }
 0x146   :  { %518 = vmatpush.bf16.msrb.mxu3 %v847_v43 }
 0x14a   :  { %519 = vmatpush.bf16.msrb.mxu3 %v846_v45 }
 0x14e   :  { %520 = vmatpush.bf16.msrb.mxu3 %v845_v47 }
 0x151   :  { %521 = vmatmul.bf16.vlgmr.msrb.gmra.mxu3 %v348_v29 }
 0x1b4   :  { %v367_v49 = vpop.f32.mrf.mxu3 }
 0x1b5   :  { %v387_v50 = vpack.c.bf16 %v367_v49, %v367_v49 }
 0x1b7   :  { %460 = vmatmul.bf16.vlgmr.msrb.gmra.mxu0 %v387_v50 }
 0x1bc   :  { %v369_v53 = vpop.f32.mrf.mxu3 }
 0x1d4   :  { %v522_v58 = vpop.f32.mrf.mxu3 }
 0x1dc   :  { %v524_v59 = vpop.f32.mrf.mxu3 }
 0x234   :  { %v461_v63 = vpop.f32.mrf.mxu0 }
 0x235   :  { %v523_v0 = vadd.f32 %v522_v58, %v461_v63 }
 0x237   :  { %v530_v1 = vadd.f32 %v885_v62, %v523_v0 }
 0x239   :  { %v531_v2 = vpack.c.bf16 %v530_v1, %v530_v1 }
 0x23b   :  { %608 = vmatmul.bf16.vlgmr.msrb.gmra.mxu1 %v531_v2 }
 0x23c   :  { %v463_v3 = vpop.f32.mrf.mxu0 }
 0x2b8   :  { %v609_v5 = vpop.f32.mrf.mxu1 }
 0x2b9   :  { %v610_v6 = vadd.f32 %v886_v4, %v609_v5 }
 0x2bb   :  { %v613_v7 = vmax.f32 %v610_v6, 0.0 }
 0x2bd   :  { %615 = vrot.lane.b32.xlu0 %v613_v7, %s1129_s6 }
 0x2c0   :  { %v611_v8 = vpop.f32.mrf.mxu1 }
 0x32f   :  { %v616_v10 = vpop.permute.xlu0 %615 }
 0x330   :  { %v618_v11 = vsub.f32 %v613_v7, %v616_v10 }
 0x332   :  { %v619_v12 = vmul.f32 1.442695, %v618_v11 }
 0x334   :  { %887 = vpow2.f32 %v619_v12 }
 0x33a   :  { %v888_v13 = vpop.eup %887 }
 0x33b   :  { %v621_v14 = vadd.f32 1.0, %v888_v13 }
 0x33d   :  { %889 = vrcp.f32 %v621_v14 }
 0x343   :  { %v890_v15 = vpop.eup %889 }
 0x344   :  { %630 = vperm.xlu0 %882, %v890_v15   ;;  %v623_v16 = vsub.f32 1.0, %v890_v15 }
 0x346   :  { %636 = vperm.xlu1 %883, %v623_v16  }
 0x3b6   :  { %v631_v19 = vpop.permute.xlu0 %630 }
 0x3b7   :  { %v633_v20 = vsel %vm627_vm3, %v631_v19, 0.0 }
 0x3b8   :  { %v637_v21 = vpop.permute.xlu1 %636 }
 0x3b9   :  { %v639_v22 = vsel %vm626_vm4, %v637_v21, %v633_v20 }
 0x3ba   :  { %640 = vst [vmem:[#allocation16] sm:$0xff] %v639_v22 }
 0x3bb   :  { %651 = dma.vmem_to_hbm [thread:$0]  %s647_s10, 128, %s649_s18, [#allocation4]  }
 0x3bc   :  { %1117 = dma.done.wait [#allocation4], 128  }
 0x3bd   :  { %1118 = vsyncadd [#allocation4], 4294967168 }
 0x3be   :  { %656 = vsyncpa [#allocation3], 1 }
 0x3bf   :  { %657 = vsyncpa [#allocation6], 1 }
 0x3c0   :  { %658 = vsyncpa [#allocation9], 1 }
 0x3c1   :  { %659 = vsyncpa [#allocation12], 1 }
 0x3c2   :  { %660 = vsyncpa [#allocation15], 1 }
 0x3c3   :  { %661 = vsyncpa [#allocation4], 1 }

</bundles_post_ra>
